<compile_context>
chip_gen: v7x
topology: tpu7x:2x2x1
jax: 0.10.0
libtpu: 0.0.40
codegen_flags: <defaults>
</compile_context>

<pallas_src>
import functools

import jax
import jax.numpy as jnp
from jax.experimental import pallas as pl
from jax.experimental.pallas import tpu as pltpu

_LANE = 128
_SINGLE_BLOCK_MAX_BYTES = 1 * 1024 * 1024   # above this, force >=2 (even) blocks for megacore
_SMALL_TENSOR_BYTES = 256 * 1024            # below this, plain JAX beats kernel dispatch cost


def _alpha_mul_kernel(alpha_ref, x_ref, o_ref):
    # alpha_ref: SMEM (1,) float32 scalar; x_ref/o_ref: VMEM (block_rows, lane) tiles.
    # Cast the scalar once to the data dtype so bf16/fp8 tiles stay narrow on the VALU
    # (avoids a per-vreg upcast+downcast pair on v6e/v7x).
    a = alpha_ref[0].astype(x_ref.dtype)
    o_ref[...] = (x_ref[...] * a).astype(o_ref.dtype)


def _sublane_packing(dtype):
    # rows-per-vreg packing: 8 for f32, 16 for bf16/f16, 32 for int8/fp8
    itemsize = jnp.dtype(dtype).itemsize
    return max(8, (32 // (8 * itemsize)) * 8)


@functools.cache
def _vmem_budget():
    """(target_tile_bytes, vmem_limit_bytes) sized for the current TPU generation."""
    phys = 64 * 1024 * 1024                       # conservative fallback == v7x per-TC VMEM
    try:
        phys = int(pltpu.get_tpu_info().vmem_capacity_bytes)
    except Exception:
        pass
    if phys >= 128 * 1024 * 1024:
        # v5e / v6e: 128 MiB physical; big tiles amortize the ~0.35 us per grid step,
        # which matters most on v5e's lower HBM bandwidth.
        return 8 * 1024 * 1024, 64 * 1024 * 1024
    # v7x: only 64 MiB per TensorCore — keep in+out double-buffered (4x tile) well inside it.
    return 4 * 1024 * 1024, 32 * 1024 * 1024


def _choose_block_rows(rows, lane, itemsize, packing, target_tile_bytes):
    total_bytes = rows * lane * itemsize
    if rows < packing or total_bytes <= _SINGLE_BLOCK_MAX_BYTES:
        return rows                                # single full-dim block (always layout-legal)
    bytes_per_row = lane * itemsize
    max_rows = max(packing, (target_tile_bytes // bytes_per_row) // packing * packing)
    nblocks = pl.cdiv(rows, max_rows)
    nblocks = max(nblocks, 2)                      # >=2 blocks so both v7x TCs get work
    if nblocks % 2:
        nblocks += 1                               # even count -> balanced 2-TC split
    block_rows = pl.cdiv(rows, nblocks)
    block_rows = ((block_rows + packing - 1) // packing) * packing   # unmasked stores
    return min(block_rows, rows)


def alpha_forward(alpha_param, x, *, min_pallas_bytes=_SMALL_TENSOR_BYTES, donate_x=False):
    """Pallas implementation of alpha.forward: out = alpha * x (broadcast scalar)."""
    orig_shape = x.shape
    dtype = x.dtype
    n = x.size
    itemsize = jnp.dtype(dtype).itemsize

    # SMEM scalars are 32-bit: carry alpha as f32 and cast to the data dtype in-kernel.
    alpha_f32 = jnp.asarray(alpha_param, dtype=jnp.float32).reshape((1,))

    # Small-tensor fast path: CIFAR-sized activations cost nanoseconds of HBM traffic
    # but microseconds of kernel dispatch; also lets XLA fuse the multiply into neighbors.
    if n == 0 or n * itemsize < min_pallas_bytes:
        return (alpha_f32[0].astype(dtype) * x).astype(dtype)

    flat = x.reshape(-1)
    tail = n % _LANE
    bulk = n - tail
    bulk_flat = flat[:bulk] if tail else flat

    # Lane-dense slab: widest last dim (multiple of 128) dividing the bulk element count.
    lane = _LANE
    for cand in (4096, 2048, 1024, 512, 256, 128):
        if bulk % cand == 0:
            lane = cand
            break
    rows = bulk // lane
    x2 = bulk_flat.reshape(rows, lane)

    target_tile_bytes, vmem_limit_bytes = _vmem_budget()
    packing = _sublane_packing(dtype)
    block_rows = _choose_block_rows(rows, lane, itemsize, packing, target_tile_bytes)
    grid = (pl.cdiv(rows, block_rows),)

    out2 = pl.pallas_call(
        _alpha_mul_kernel,
        out_shape=jax.ShapeDtypeStruct((rows, lane), dtype),
        grid_spec=pltpu.PrefetchScalarGridSpec(
            num_scalar_prefetch=0,
            grid=grid,
            in_specs=[
                pl.BlockSpec(memory_space=pltpu.MemorySpace.SMEM),   # alpha scalar
                pl.BlockSpec((block_rows, lane), lambda i: (i, 0)),  # x tile
            ],
            out_specs=pl.BlockSpec((block_rows, lane), lambda i: (i, 0)),
        ),
        compiler_params=pltpu.CompilerParams(
            dimension_semantics=("parallel",),      # shard blocks across v7x's 2 TensorCores
            vmem_limit_bytes=vmem_limit_bytes,
        ),
        cost_estimate=pl.CostEstimate(
            flops=bulk,
            transcendentals=0,
            bytes_accessed=2 * bulk * itemsize,
        ),
        input_output_aliases=({1: 0} if donate_x else {}),  # opt-in: reuse x's HBM buffer
    )(alpha_f32, x2)

    out_flat = out2.reshape(-1)
    if tail:
        # Rare fallback (<128 leftover elems): tiny tail in plain JAX instead of a
        # pad+slice round trip of the whole tensor through HBM.
        tail_out = (alpha_f32[0].astype(dtype) * flat[bulk:]).astype(dtype)
        out_flat = jnp.concatenate([out_flat, tail_out])
    return out_flat.reshape(orig_shape)


if __name__ == "__main__":
    key = jax.random.PRNGKey(0)

    # Deterministic parameter init (module default alpha_val=0 would give all-zeros output;
    # use a nonzero value so the multiply is observable — shape matches nn.Parameter([alpha_val])).
    alpha_val = 0.75
    alpha_param = jnp.array([alpha_val], dtype=jnp.float32)   # shape (1,)

    # 1) Small CIFAR-like input (2,4,16,16), forced through the Pallas kernel.
    x_small = jax.random.normal(key, (2, 4, 16, 16), dtype=jnp.float32)
    out_small = jax.block_until_ready(alpha_forward(alpha_param, x_small, min_pallas_bytes=0))
    ref_small = alpha_param[0] * x_small
    assert out_small.shape == x_small.shape and out_small.dtype == x_small.dtype
    assert jnp.allclose(out_small, ref_small, atol=1e-6, rtol=1e-6)

    # 2) Same small input through the default (fast) path.
    out_fast = jax.block_until_ready(alpha_forward(alpha_param, x_small))
    assert jnp.allclose(out_fast, ref_small, atol=1e-6, rtol=1e-6)

    # 3) Medium activation (2 MiB) exercising the multi-block, megacore-friendly grid.
    k2, _ = jax.random.split(key)
    x_med = jax.random.normal(k2, (8, 64, 32, 32), dtype=jnp.float32)
    out_med = jax.block_until_ready(alpha_forward(alpha_param, x_med))
    ref_med = alpha_param[0] * x_med
    assert out_med.shape == x_med.shape and out_med.dtype == x_med.dtype
    assert jnp.allclose(out_med, ref_med, atol=1e-6, rtol=1e-6)

    print("KERNEL_OK")
</pallas_src>

<mosaic_0001>
module attributes {stable_mosaic.version = 11 : i64} {
  func.func @_alpha_mul_kernel(%arg0: i32, %arg1: memref<1xf32, #tpu.memory_space<smem>>, %arg2: memref<1x2048xf32, #tpu.memory_space<vmem>>, %arg3: memref<1x2048xf32, #tpu.memory_space<vmem>>) attributes {dimension_semantics = [#tpu.dimension_semantics<parallel>], iteration_bounds = array<i64: 1>, scalar_prefetch = 0 : i64, scratch_operands = 0 : i64, tpu.core_type = #tpu.core_type<tc>, window_params = [{transform_indices = @transform_0, window_bounds = array<i64: 1>}, {transform_indices = @transform_1, window_bounds = array<i64: 1, 2048>}, {transform_indices = @transform_2, window_bounds = array<i64: 1, 2048>}]} {
    %c0 = arith.constant 0 : index
    %0 = memref.load %arg1[%c0] : memref<1xf32, #tpu.memory_space<smem>>
    %c0_0 = arith.constant 0 : index
    %c0_1 = arith.constant 0 : index
    %1 = vector.load %arg2[%c0_0, %c0_1] : memref<1x2048xf32, #tpu.memory_space<vmem>>, vector<1x2048xf32>
    %2 = vector.broadcast %0 : f32 to vector<1x2048xf32>
    %3 = arith.mulf %1, %2 : vector<1x2048xf32>
    %c0_2 = arith.constant 0 : index
    %c0_3 = arith.constant 0 : index
    %4 = vector.load %arg3[%c0_2, %c0_3] : memref<1x2048xf32, #tpu.memory_space<vmem>>, vector<1x2048xf32>
    tpu.vector_store %arg3[%c0_2, %c0_3], %3 {strides = array<i32>} : memref<1x2048xf32, #tpu.memory_space<vmem>>, vector<1x2048xf32>,
    return
  }
  func.func @transform_0(%arg0: i32) -> i32 {
    %c0_i32 = arith.constant 0 : i32
    %c0_i32_0 = arith.constant 0 : i32
    return %c0_i32 : i32
  }
  func.func @transform_1(%arg0: i32) -> (i32, i32) {
    %c0_i32 = arith.constant 0 : i32
    %c0_i32_0 = arith.constant 0 : i32
    return %arg0, %c0_i32 : i32, i32
  }
  func.func @transform_2(%arg0: i32) -> (i32, i32) {
    %c0_i32 = arith.constant 0 : i32
    %c0_i32_0 = arith.constant 0 : i32
    return %arg0, %c0_i32 : i32, i32
  }
}

</mosaic_0001>

<bundles_post_ra>
// kernel: tpu_custom_call.1
= control target key start
LH: loop header
LB: loop body
LE: loop exit
PB: predicated region body
PF: predicated region fallthrough
CT: control target
= control target key end

     0   :  { %8 = vsyncpa [#allocation4], 0  ;;  %s142_s0 = inlined_call_operand.<no memory space> [shape: f32[1], index: 0, kind: input, shape index: {}]   ;;  %s143_s1 = inlined_call_operand.hbm [shape: f32[1,2048], index: 1, kind: input, shape index: {}]   ;;  %s144_s2 = inlined_call_operand.hbm [shape: f32[1,2048], index: 2, kind: output, shape index: {}]  }
   0x1   :  { %9 = vsyncpa [#allocation5], 0  ;;  %s98_s9 = smov [#allocation3]   ;;  %s50_s13 = scalar_lea.hbm %s143_s1, 256 }
   0x2   :  { %s18_s10 = sshll.u32 %s98_s9, 4  ;;  %p51_p0 = scmp.ne.s32.totalorder %s143_s1, %s50_s13  ;;  %s19_s10 = int_to_ptr.vmem [resolvable:$true] %s18_s10 }
   0x3   :  { %p54_p1 = scmp.lt.u32.totalorder %s50_s13, %s143_s1 }
   0x5   :  { %p56_p2 = pnand %p54_p1, %p51_p0 }
   0x7   :  { %59 = shalt.err (!%p56_p2)
}
   0x8   :  { %s60_s18 = scalar_lea.vmem %s19_s10, 256  ;;  %p65_p4 = scmp.lt.s32.totalorder %s19_s10, %s19_s10 }
   0x9   :  { %p61_p3 = scmp.ne.s32.totalorder %s19_s10, %s60_s18  ;;  %p66_p5 = scmp.lt.s32.totalorder %s60_s18, %s60_s18 }
   0xb   :  { %p67_p6 = por %p66_p5, %p65_p4 }
   0xd   :  { %p68_p7 = pnand %p67_p6, %p61_p3 }
   0xf   :  { %71 = shalt.err (!%p68_p7)
}
  0x10   :  { %21 = dma.hbm_to_vmem [thread:$0]  %s143_s1, 256, %s19_s10, [#allocation4]  }
  0x11   :  { %94 = dma.done.wait [#allocation4], 256  }
  0x12   :  { %95 = vsyncadd [#allocation4], 4294967040  ;;  %v28_v0 = vstv %s142_s0  ;;  %s99_s23 = smov [#allocation6]   ;;  %v26_v1 = vld [vmem:[#allocation3] sm:$0xff]  ;;  %v27_v2 = vld [vmem:[#allocation3 + $0x8] sm:$0xff] }
  0x13   :  { %s39_s24 = sshll.u32 %s99_s23, 4  ;;  %v29_v3 = vmul.f32 %v28_v0, %v26_v1  ;;  %v30_v4 = vmul.f32 %v28_v0, %v27_v2  ;;  %s40_s24 = int_to_ptr.vmem [resolvable:$true] %s39_s24 }
  0x14   :  { %s72_s25 = scalar_lea.vmem %s40_s24, 256  ;;  %p77_p9 = scmp.lt.s32.totalorder %s40_s24, %s40_s24 }
  0x15   :  { %31 = vst [vmem:[#allocation6] sm:$0xff] %v29_v3  ;;  %32 = vst [vmem:[#allocation6 + $0x8] sm:$0xff] %v30_v4  ;;  %p73_p8 = scmp.ne.s32.totalorder %s40_s24, %s72_s25  ;;  %p78_p10 = scmp.lt.s32.totalorder %s72_s25, %s72_s25 }
  0x17   :  { %p79_p11 = por %p78_p10, %p77_p9 }
  0x19   :  { %p80_p12 = pnand %p79_p11, %p73_p8 }
  0x1b   :  { %83 = shalt.err (!%p80_p12)
}
  0x1c   :  { %s84_s0 = scalar_lea.hbm %s144_s2, 256 }
  0x1d   :  { %p85_p13 = scmp.ne.s32.totalorder %s144_s2, %s84_s0  ;;  %p88_p0 = scmp.lt.u32.totalorder %s84_s0, %s144_s2 }
  0x1f   :  { %p90_p1 = pnand %p88_p0, %p85_p13 }
  0x21   :  { %93 = shalt.err (!%p90_p1)
}
  0x22   :  { %42 = dma.vmem_to_hbm [thread:$0]  %s40_s24, 256, %s144_s2, [#allocation5]  }
  0x23   :  { %96 = dma.done.wait [#allocation5], 256  }
  0x24   :  { %97 = vsyncadd [#allocation5], 4294967040 }
  0x25   :  { %46 = vsyncpa [#allocation4], 1 }
  0x26   :  { %47 = vsyncpa [#allocation5], 1 }

</bundles_post_ra>
